<compile_context>
chip_gen: v7x
topology: tpu7x:2x2x1
jax: 0.10.0
libtpu: 0.0.40
codegen_flags: <defaults>
</compile_context>

<pallas_src>
import functools

import jax
import jax.numpy as jnp
from jax.experimental import pallas as pl
from jax.experimental.pallas import tpu as pltpu

C_PAD = 128  # classes padded 10 -> 128 for lane-dense stores
K_IN = 784   # 28*28 input features


def _round_up(x, m):
    return ((x + m - 1) // m) * m


def _cdiv(a, b):
    return (a + b - 1) // b


def mlp_logsoftmax_kernel(x_ref, w1_ref, b1_ref, w2_ref, b2_ref, o_ref):
    # x_ref : (TB, 784)    input dtype (f32 or bf16) -- cast to bf16 in-kernel
    # w1_ref: (784, H_pad) bf16     b1_ref: (1, H_pad) f32
    # w2_ref: (H_pad, 128) bf16     b2_ref: (1, 128)   f32  (pad class lanes = -1e9)
    # o_ref : (TB, 128)    bf16
    x = x_ref[...].astype(jnp.bfloat16)

    # fc1 + ReLU (bf16 MXU operands, f32 accumulation, f32 bias/activation)
    h = jnp.dot(x, w1_ref[...], preferred_element_type=jnp.float32) + b1_ref[...]
    h = jnp.maximum(h, 0.0)

    # fc2 (hidden back to bf16 for the MXU; accumulate in f32)
    logits = (
        jnp.dot(h.astype(jnp.bfloat16), w2_ref[...], preferred_element_type=jnp.float32)
        + b2_ref[...]
    )

    # log_softmax along dim=1 (numerically stable).  Pad class lanes carry a -1e9
    # bias and zero weight columns, so exp(logit - m) underflows to exactly 0 for
    # them and they never win the max.
    m = jnp.max(logits, axis=-1, keepdims=True)
    lse = m + jnp.log(jnp.sum(jnp.exp(logits - m), axis=-1, keepdims=True))
    o_ref[...] = (logits - lse).astype(o_ref.dtype)


def prepare_params(w1, b1, w2, b2):
    """One-time conversion of PyTorch-layout params to kernel layout.

    w1: (H, 784), b1: (H,), w2: (10, H), b2: (10,)  (as in nn.Linear)
    Returns (w1t, b1p, w2t, b2p): transposed / padded / cast for the kernel.
    """
    H = w1.shape[0]
    H_pad = _round_up(H, 128)

    w1t = jnp.zeros((K_IN, H_pad), jnp.bfloat16)
    w1t = w1t.at[:, :H].set(jnp.transpose(w1).astype(jnp.bfloat16))

    b1p = jnp.zeros((1, H_pad), jnp.float32)
    b1p = b1p.at[0, :H].set(b1.astype(jnp.float32))

    w2t = jnp.zeros((H_pad, C_PAD), jnp.bfloat16)
    w2t = w2t.at[:H, :10].set(jnp.transpose(w2).astype(jnp.bfloat16))

    # pad class lanes get a large (but bf16-safe) negative bias -> masked out of logsumexp
    b2p = jnp.full((1, C_PAD), -1e9, jnp.float32)
    b2p = b2p.at[0, :10].set(b2.astype(jnp.float32))

    return w1t, b1p, w2t, b2p


def net_forward(x, params, tb=512):
    """Equivalent of Net.forward: log_softmax(fc2(relu(fc1(x.view(-1, 784))))).

    x      : (B, 1, 28, 28) or anything reshapeable to (-1, 784); f32 or bf16.
    params : output of prepare_params.
    returns: (B, 10) log-probabilities, float32.
    """
    w1t, b1p, w2t, b2p = params
    K, H_pad = w1t.shape
    C_pad = w2t.shape[1]

    x2 = x.reshape(-1, K)          # no K padding, no wrapper-side cast
    B = x2.shape[0]

    # Batch tile: multiple of 16 rows (bf16 output packing), capped at `tb`, and
    # chosen so large batches produce >= ~4 grid steps (v7x megacore + pipelining).
    TB = max(16, min(_round_up(tb, 16), _round_up(_cdiv(B, 4), 16)))
    B_pad = _round_up(B, TB)
    xp = x2 if B_pad == B else jnp.pad(x2, ((0, B_pad - B), (0, 0)))
    n_steps = B_pad // TB

    # Resident (constant-index) weight blocks: single-buffer them if they're large
    # enough to matter for v7x's 64 MiB VMEM; double-buffering a block that is
    # re-used every grid step buys nothing.
    big_weights = (w1t.size + w2t.size) * 2 > (4 << 20)

    def resident(shape):
        if big_weights:
            return pl.BlockSpec(shape, lambda i: (0, 0), pipeline_mode=pl.Buffered(1))
        return pl.BlockSpec(shape, lambda i: (0, 0))

    out = pl.pallas_call(
        mlp_logsoftmax_kernel,
        out_shape=jax.ShapeDtypeStruct((B_pad, C_pad), jnp.bfloat16),
        grid=(n_steps,),
        in_specs=[
            pl.BlockSpec((TB, K), lambda i: (i, 0)),   # activations: tiled over batch
            resident((K, H_pad)),                      # fc1 weight: VMEM-resident
            resident((1, H_pad)),                      # fc1 bias
            resident((H_pad, C_pad)),                  # fc2 weight
            resident((1, C_pad)),                      # fc2 bias (pad lanes -1e9)
        ],
        out_specs=pl.BlockSpec((TB, C_pad), lambda i: (i, 0)),
        compiler_params=pltpu.CompilerParams(
            dimension_semantics=("parallel",),
            # vmem_limit_bytes intentionally omitted: footprint is a few MiB, the
            # default scoped VMEM limit is more than enough on v5e/v6e/v7x.
        ),
    )(xp, w1t, b1p, w2t, b2p)

    return out[:B, :10].astype(jnp.float32)


def init_params(key, n_hid):
    """Deterministic init matching nn.Linear shapes (Kaiming-uniform-ish bounds)."""
    k1, k2, k3, k4 = jax.random.split(key, 4)
    bound1 = 1.0 / jnp.sqrt(784.0)
    bound2 = 1.0 / jnp.sqrt(float(n_hid))
    w1 = jax.random.uniform(k1, (n_hid, 784), jnp.float32, -bound1, bound1)
    b1 = jax.random.uniform(k2, (n_hid,), jnp.float32, -bound1, bound1)
    w2 = jax.random.uniform(k3, (10, n_hid), jnp.float32, -bound2, bound2)
    b2 = jax.random.uniform(k4, (10,), jnp.float32, -bound2, bound2)
    return w1, b1, w2, b2


if __name__ == "__main__":
    key = jax.random.PRNGKey(0)
    kx, kp = jax.random.split(key)

    batch = 8
    n_hid = 32
    # MNIST-like NCHW input; forward flattens to (-1, 784)
    x = jax.random.normal(kx, (batch, 1, 28, 28), jnp.float32)
    w1, b1, w2, b2 = init_params(kp, n_hid)

    # one-time parameter prep (transpose / pad / bf16 cast), kept out of the hot path
    params = prepare_params(w1, b1, w2, b2)

    fwd = jax.jit(functools.partial(net_forward, tb=512))
    out = jax.block_until_ready(fwd(x, params))

    # Sanity check against a pure-JAX f32 reference of the same forward pass.
    # bf16 matmul operands / bf16 output (f32 accumulation) -> loosened tolerance.
    xr = x.reshape(-1, 784)
    h_ref = jnp.maximum(xr @ w1.T + b1, 0.0)
    logits_ref = h_ref @ w2.T + b2
    ref = logits_ref - jax.scipy.special.logsumexp(logits_ref, axis=1, keepdims=True)

    assert out.shape == (batch, 10)
    assert bool(jnp.all(jnp.isfinite(out)))
    err = float(jnp.max(jnp.abs(out - ref)))
    assert jnp.allclose(out, ref, atol=5e-2, rtol=0.0), err

    print("KERNEL_OK")
</pallas_src>

<mosaic_0001>
module attributes {stable_mosaic.version = 11 : i64} {
  func.func @mlp_logsoftmax_kernel(%arg0: i32, %arg1: memref<16x784xf32, #tpu.memory_space<vmem>>, %arg2: memref<784x128xbf16, #tpu.memory_space<vmem>>, %arg3: memref<1x128xf32, #tpu.memory_space<vmem>>, %arg4: memref<128x128xbf16, #tpu.memory_space<vmem>>, %arg5: memref<1x128xf32, #tpu.memory_space<vmem>>, %arg6: memref<16x128xbf16, #tpu.memory_space<vmem>>) attributes {dimension_semantics = [#tpu.dimension_semantics<parallel>], iteration_bounds = array<i64: 1>, scalar_prefetch = 0 : i64, scratch_operands = 0 : i64, tpu.core_type = #tpu.core_type<tc>, window_params = [{transform_indices = @transform_0, window_bounds = array<i64: 16, 784>}, {pipeline_mode = #tpu.pipeline_mode<synchronous>, transform_indices = @transform_1, window_bounds = array<i64: 784, 128>}, {pipeline_mode = #tpu.pipeline_mode<synchronous>, transform_indices = @transform_2, window_bounds = array<i64: 1, 128>}, {pipeline_mode = #tpu.pipeline_mode<synchronous>, transform_indices = @transform_3, window_bounds = array<i64: 128, 128>}, {pipeline_mode = #tpu.pipeline_mode<synchronous>, transform_indices = @transform_4, window_bounds = array<i64: 1, 128>}, {transform_indices = @transform_5, window_bounds = array<i64: 16, 128>}]} {
    %c0 = arith.constant 0 : index
    %c0_0 = arith.constant 0 : index
    %0 = vector.load %arg1[%c0, %c0_0] : memref<16x784xf32, #tpu.memory_space<vmem>>, vector<16x784xf32>
    %1 = arith.truncf %0 : vector<16x784xf32> to vector<16x784xbf16>
    %c0_1 = arith.constant 0 : index
    %c0_2 = arith.constant 0 : index
    %2 = vector.load %arg2[%c0_1, %c0_2] : memref<784x128xbf16, #tpu.memory_space<vmem>>, vector<784x128xbf16>
    %cst = arith.constant dense<0.000000e+00> : vector<16x128xf32>
    %3 = tpu.matmul %1, %2, %cst {dimension_numbers = #tpu.dot_dimension_numbers<[1], [0], [0], [1], [0, 0, 1, 1], [], []>} : vector<16x784xbf16>, vector<784x128xbf16>, vector<16x128xf32> -> vector<16x128xf32>
    %c0_3 = arith.constant 0 : index
    %c0_4 = arith.constant 0 : index
    %4 = vector.load %arg3[%c0_3, %c0_4] : memref<1x128xf32, #tpu.memory_space<vmem>>, vector<1x128xf32>
    %5 = vector.broadcast %4 : vector<1x128xf32> to vector<16x128xf32>
    %6 = arith.addf %3, %5 : vector<16x128xf32>
    %cst_5 = arith.constant 0.000000e+00 : f32
    %7 = vector.broadcast %cst_5 : f32 to vector<16x128xf32>
    %8 = arith.maximumf %6, %7 : vector<16x128xf32>
    %9 = arith.truncf %8 : vector<16x128xf32> to vector<16x128xbf16>
    %c0_6 = arith.constant 0 : index
    %c0_7 = arith.constant 0 : index
    %10 = vector.load %arg4[%c0_6, %c0_7] : memref<128x128xbf16, #tpu.memory_space<vmem>>, vector<128x128xbf16>
    %cst_8 = arith.constant dense<0.000000e+00> : vector<16x128xf32>
    %11 = tpu.matmul %9, %10, %cst_8 {dimension_numbers = #tpu.dot_dimension_numbers<[1], [0], [0], [1], [0, 0, 1, 1], [], []>} : vector<16x128xbf16>, vector<128x128xbf16>, vector<16x128xf32> -> vector<16x128xf32>
    %c0_9 = arith.constant 0 : index
    %c0_10 = arith.constant 0 : index
    %12 = vector.load %arg5[%c0_9, %c0_10] : memref<1x128xf32, #tpu.memory_space<vmem>>, vector<1x128xf32>
    %13 = vector.broadcast %12 : vector<1x128xf32> to vector<16x128xf32>
    %14 = arith.addf %11, %13 : vector<16x128xf32>
    %cst_11 = arith.constant dense<0xFF800000> : vector<16xf32>
    %15 = vector.multi_reduction <maximumf>, %14, %cst_11 [1] : vector<16x128xf32> to vector<16xf32>
    %16 = vector.shape_cast %15 : vector<16xf32> to vector<16x1xf32>
    %17 = vector.broadcast %16 : vector<16x1xf32> to vector<16x128xf32>
    %18 = arith.subf %14, %17 : vector<16x128xf32>
    %19 = math.exp %18 : vector<16x128xf32>
    %cst_12 = arith.constant dense<0.000000e+00> : vector<16xf32>
    %20 = vector.multi_reduction <add>, %19, %cst_12 [1] : vector<16x128xf32> to vector<16xf32>
    %21 = vector.shape_cast %20 : vector<16xf32> to vector<16x1xf32>
    %22 = math.log %21 : vector<16x1xf32>
    %23 = arith.addf %16, %22 : vector<16x1xf32>
    %24 = vector.broadcast %23 : vector<16x1xf32> to vector<16x128xf32>
    %25 = arith.subf %14, %24 : vector<16x128xf32>
    %26 = arith.truncf %25 : vector<16x128xf32> to vector<16x128xbf16>
    %c0_13 = arith.constant 0 : index
    %c0_14 = arith.constant 0 : index
    %27 = vector.load %arg6[%c0_13, %c0_14] : memref<16x128xbf16, #tpu.memory_space<vmem>>, vector<16x128xbf16>
    tpu.vector_store %arg6[%c0_13, %c0_14], %26 {strides = array<i32>} : memref<16x128xbf16, #tpu.memory_space<vmem>>, vector<16x128xbf16>,
    return
  }
  func.func @transform_0(%arg0: i32) -> (i32, i32) {
    %c0_i32 = arith.constant 0 : i32
    %c0_i32_0 = arith.constant 0 : i32
    return %arg0, %c0_i32 : i32, i32
  }
  func.func @transform_1(%arg0: i32) -> (i32, i32) {
    %c0_i32 = arith.constant 0 : i32
    %c0_i32_0 = arith.constant 0 : i32
    %c0_i32_1 = arith.constant 0 : i32
    return %c0_i32, %c0_i32_0 : i32, i32
  }
  func.func @transform_2(%arg0: i32) -> (i32, i32) {
    %c0_i32 = arith.constant 0 : i32
    %c0_i32_0 = arith.constant 0 : i32
    %c0_i32_1 = arith.constant 0 : i32
    return %c0_i32, %c0_i32_0 : i32, i32
  }
  func.func @transform_3(%arg0: i32) -> (i32, i32) {
    %c0_i32 = arith.constant 0 : i32
    %c0_i32_0 = arith.constant 0 : i32
    %c0_i32_1 = arith.constant 0 : i32
    return %c0_i32, %c0_i32_0 : i32, i32
  }
  func.func @transform_4(%arg0: i32) -> (i32, i32) {
    %c0_i32 = arith.constant 0 : i32
    %c0_i32_0 = arith.constant 0 : i32
    %c0_i32_1 = arith.constant 0 : i32
    return %c0_i32, %c0_i32_0 : i32, i32
  }
  func.func @transform_5(%arg0: i32) -> (i32, i32) {
    %c0_i32 = arith.constant 0 : i32
    %c0_i32_0 = arith.constant 0 : i32
    return %arg0, %c0_i32 : i32, i32
  }
}

</mosaic_0001>

<bundles_post_ra>
// kernel: net_forward.1
= control target key start
LH: loop header
LB: loop body
LE: loop exit
PB: predicated region body
PF: predicated region fallthrough
CT: control target
= control target key end

     0   :  { %v999_v43 = vmov 0.0   ;;  %vm1000_vm0 = vmmov 0   ;;  %vm441_vm1 = vcmask 130048   ;;  %s1266_s1 = inlined_call_operand.vmem [shape: bf16[784,128], index: 1, kind: input, shape index: {}]   ;;  %s1267_s0 = inlined_call_operand.vmem [shape: f32[16,784], index: 0, kind: input, shape index: {}]   ;;  %s1268_s3 = inlined_call_operand.vmem [shape: bf16[128,128], index: 3, kind: input, shape index: {}]   ;;  %s1269_s2 = inlined_call_operand.vmem [shape: f32[1,128], index: 2, kind: input, shape index: {}]   ;;  %s1270_s4 = inlined_call_operand.vmem [shape: f32[1,128], index: 4, kind: input, shape index: {}]   ;;  %s1271_s5 = inlined_call_operand.vmem [shape: bf16[16,128], index: 5, kind: output, shape index: {}]  }
   0x1   :  { %v934_v0 = vld [vmem:[%s1266_s1 + $0x40] sm:$0xff]   ;;  %v938_v4 = vld [vmem:[%s1266_s1 + $0x48] sm:$0xff]   ;;  %v942_v8 = vld [vmem:[%s1266_s1 + $0x50] sm:$0xff]  }
   0x2   :  { %v935_v1 = vld [vmem:[%s1266_s1] sm:$0xff]   ;;  %829 = vmatprep.subr.bf16.mxu0 %v934_v0  ;;  %v939_v5 = vld [vmem:[%s1266_s1 + $0x8] sm:$0xff]   ;;  %v943_v9 = vld [vmem:[%s1266_s1 + $0x10] sm:$0xff]  }
   0x3   :  { %v936_v2 = vld [vmem:[%s1266_s1 + $0xc0] sm:$0xff]   ;;  %830 = vmatpush3.bf16.msra.mxu0 %v935_v1  ;;  %v940_v6 = vld [vmem:[%s1266_s1 + $0xc8] sm:$0xff]   ;;  %v944_v10 = vld [vmem:[%s1266_s1 + $0xd0] sm:$0xff]  }
   0x4   :  { %v937_v3 = vld [vmem:[%s1266_s1 + $0x80] sm:$0xff]   ;;  %851 = vmatprep.subr.bf16.mxu1 %v936_v2  ;;  %831 = vmatprep.subr.bf16.mxu0 %v938_v4  ;;  %v941_v7 = vld [vmem:[%s1266_s1 + $0x88] sm:$0xff]   ;;  %v945_v11 = vld [vmem:[%s1266_s1 + $0x90] sm:$0xff]  }
   0x5   :  { %852 = vmatpush3.bf16.msra.mxu1 %v937_v3  ;;  %v946_v12 = vld [vmem:[%s1266_s1 + $0x58] sm:$0xff]   ;;  %v950_v16 = vld [vmem:[%s1266_s1 + $0x60] sm:$0xff]   ;;  %v954_v20 = vld [vmem:[%s1266_s1 + $0x68] sm:$0xff]  }
   0x6   :  { %853 = vmatprep.subr.bf16.mxu1 %v940_v6  ;;  %v947_v13 = vld [vmem:[%s1266_s1 + $0x18] sm:$0xff]   ;;  %v951_v17 = vld [vmem:[%s1266_s1 + $0x20] sm:$0xff]   ;;  %v955_v21 = vld [vmem:[%s1266_s1 + $0x28] sm:$0xff]  }
   0x7   :  { %832 = vmatpush3.bf16.msra.mxu0 %v939_v5  ;;  %v948_v14 = vld [vmem:[%s1266_s1 + $0xd8] sm:$0xff]   ;;  %v952_v18 = vld [vmem:[%s1266_s1 + $0xe0] sm:$0xff]   ;;  %v956_v22 = vld [vmem:[%s1266_s1 + $0xe8] sm:$0xff]  }
   0x8   :  { %833 = vmatprep.subr.bf16.mxu0 %v942_v8  ;;  %v949_v15 = vld [vmem:[%s1266_s1 + $0x98] sm:$0xff]   ;;  %v953_v19 = vld [vmem:[%s1266_s1 + $0xa0] sm:$0xff]   ;;  %v957_v23 = vld [vmem:[%s1266_s1 + $0xa8] sm:$0xff]  }
   0x9   :  { %854 = vmatpush3.bf16.msra.mxu1 %v941_v7  ;;  %v958_v24 = vld [vmem:[%s1266_s1 + $0x70] sm:$0xff]   ;;  %v962_v28 = vld [vmem:[%s1266_s1 + $0x78] sm:$0xff]   ;;  %v22_v31 = vld [vmem:[%s1267_s0 + $0x8] sm:$0xff] }
   0xa   :  { %855 = vmatprep.subr.bf16.mxu1 %v944_v10  ;;  %v959_v25 = vld [vmem:[%s1266_s1 + $0x30] sm:$0xff]   ;;  %v963_v29 = vld [vmem:[%s1266_s1 + $0x38] sm:$0xff]   ;;  %v29_v32 = vld [vmem:[%s1267_s0 + $0x40] sm:$0xff] }
   0xb   :  { %834 = vmatpush3.bf16.msra.mxu0 %v943_v9  ;;  %v960_v26 = vld [vmem:[%s1266_s1 + $0xf0] sm:$0xff]   ;;  %v964_v30 = vld [vmem:[%s1266_s1 + $0xf8] sm:$0xff]   ;;  %v36_v33 = vpack.c.bf16 %v29_v32, %v22_v31  ;;  %v21_v35 = vld [vmem:[%s1267_s0] sm:$0xff] }
   0xc   :  { %835 = vmatprep.subr.bf16.mxu0 %v946_v12  ;;  %v961_v27 = vld [vmem:[%s1266_s1 + $0xb0] sm:$0xff]   ;;  %v965_v34 = vld [vmem:[%s1266_s1 + $0xb8] sm:$0xff]   ;;  %v966_v38 = vld [vmem:[%s1266_s1 + $0x140] sm:$0xff]  }
   0xd   :  { %856 = vmatpush3.bf16.msra.mxu1 %v945_v11  ;;  %v28_v36 = vld [vmem:[%s1267_s0 + $0x38] sm:$0xff]  ;;  %477 = vmatprep.mubr.bf16.mxu0 %v36_v33  ;;  %v31_v40 = vld [vmem:[%s1267_s0 + $0x50] sm:$0xff]  ;;  %v967_v42 = vld [vmem:[%s1266_s1 + $0x100] sm:$0xff]  }
   0xe   :  { %857 = vmatprep.subr.bf16.mxu1 %v948_v14  ;;  %v35_v37 = vpack.c.bf16 %v28_v36, %v21_v35  ;;  %v24_v39 = vld [vmem:[%s1267_s0 + $0x18] sm:$0xff]  ;;  %v23_v44 = vld [vmem:[%s1267_s0 + $0x10] sm:$0xff]  ;;  %v30_v45 = vld [vmem:[%s1267_s0 + $0x48] sm:$0xff] }
   0xf   :  { %836 = vmatpush3.bf16.msra.mxu0 %v947_v13  ;;  %v38_v41 = vpack.c.bf16 %v31_v40, %v24_v39  ;;  %v37_v46 = vpack.c.bf16 %v30_v45, %v23_v44  ;;  %v968_v47 = vld [vmem:[%s1266_s1 + $0x148] sm:$0xff]   ;;  %v970_v49 = vld [vmem:[%s1266_s1 + $0x150] sm:$0xff]   ;;  %v972_v51 = vld [vmem:[%s1266_s1 + $0x158] sm:$0xff]  }
  0x10   :  { %837 = vmatprep.subr.bf16.mxu0 %v950_v16  ;;  %v969_v48 = vld [vmem:[%s1266_s1 + $0x108] sm:$0xff]   ;;  %v971_v50 = vld [vmem:[%s1266_s1 + $0x110] sm:$0xff]   ;;  %v973_v52 = vld [vmem:[%s1266_s1 + $0x118] sm:$0xff]  }
  0x11   :  { %858 = vmatpush3.bf16.msra.mxu1 %v949_v15  ;;  %518 = vmatprep.mubr.bf16.mxu1 %v38_v41  ;;  %v974_v53 = vld [vmem:[%s1266_s1 + $0x160] sm:$0xff]   ;;  %v976_v55 = vld [vmem:[%s1266_s1 + $0x168] sm:$0xff]   ;;  %v27_v61 = vld [vmem:[%s1267_s0 + $0x30] sm:$0xff] }
  0x12   :  { %859 = vmatprep.subr.bf16.mxu1 %v952_v18  ;;  %v975_v54 = vld [vmem:[%s1266_s1 + $0x120] sm:$0xff]   ;;  %v26_v57 = vld [vmem:[%s1267_s0 + $0x28] sm:$0xff]  ;;  %v978_v63 = vld [vmem:[%s1266_s1 + $0x170] sm:$0xff]  }
  0x13   :  { %838 = vmatpush3.bf16.msra.mxu0 %v951_v17  ;;  %v982_v56 = vld [vmem:[%s1266_s1 + $0x180] sm:$0xff]   ;;  %v977_v59 = vld [vmem:[%s1266_s1 + $0x128] sm:$0xff]   ;;  %v979_v1 = vld [vmem:[%s1266_s1 + $0x130] sm:$0xff]  }
  0x14   :  { %839 = vmatprep.subr.bf16.mxu0 %v954_v20  ;;  %v33_v58 = vld [vmem:[%s1267_s0 + $0x60] sm:$0xff]  ;;  %v34_v62 = vld [vmem:[%s1267_s0 + $0x68] sm:$0xff]  ;;  %v980_v2 = vld [vmem:[%s1266_s1 + $0x178] sm:$0xff]  }
  0x15   :  { %860 = vmatpush3.bf16.msra.mxu1 %v953_v19  ;;  %v40_v60 = vpack.c.bf16 %v33_v58, %v26_v57  ;;  %v41_v0 = vpack.c.bf16 %v34_v62, %v27_v61  ;;  %v981_v3 = vld [vmem:[%s1266_s1 + $0x138] sm:$0xff]   ;;  %v25_v4 = vld [vmem:[%s1267_s0 + $0x20] sm:$0xff]  ;;  %v984_v8 = vld [vmem:[%s1268_s3 + $0x8] sm:$0xff]  }
  0x16   :  { %861 = vmatprep.subr.bf16.mxu1 %v956_v22  ;;  %v32_v5 = vld [vmem:[%s1267_s0 + $0x58] sm:$0xff]  ;;  %v983_v7 = vld [vmem:[%s1268_s3] sm:$0xff]   ;;  %v985_v9 = vld [vmem:[%s1268_s3 + $0x10] sm:$0xff]  }
  0x17   :  { %840 = vmatpush3.bf16.msra.mxu0 %v955_v21  ;;  %v39_v6 = vpack.c.bf16 %v32_v5, %v25_v4  ;;  %v986_v10 = vld [vmem:[%s1268_s3 + $0x18] sm:$0xff]   ;;  %v987_v11 = vld [vmem:[%s1268_s3 + $0x20] sm:$0xff]   ;;  %v988_v12 = vld [vmem:[%s1268_s3 + $0x28] sm:$0xff]  }
  0x18   :  { %841 = vmatprep.subr.bf16.mxu0 %v958_v24  ;;  %v989_v13 = vld [vmem:[%s1268_s3 + $0x30] sm:$0xff]   ;;  %v990_v14 = vld [vmem:[%s1268_s3 + $0x38] sm:$0xff]   ;;  %v760_v16 = vld [vmem:[%s1269_s2] ss:$0 sm:$0xff] }
  0x19   :  { %862 = vmatpush3.bf16.msra.mxu1 %v957_v23 }
  0x1a   :  { %863 = vmatprep.subr.bf16.mxu1 %v960_v26 }
  0x1b   :  { %842 = vmatpush3.bf16.msra.mxu0 %v959_v25 }
  0x1c   :  { %843 = vmatprep.subr.bf16.mxu0 %v962_v28 }
  0x1d   :  { %864 = vmatpush3.bf16.msra.mxu1 %v961_v27 }
  0x1e   :  { %865 = vmatprep.subr.bf16.mxu1 %v964_v30 }
  0x1f   :  { %844 = vmatpush3.bf16.msra.mxu0 %v963_v29 }
  0x20   :  { %873 = vmatprep.subr.bf16.mxu0 %v966_v38 }
  0x21   :  { %866 = vmatpush3.bf16.msra.mxu1 %v965_v34 }
  0x22   :  { %906 = vmatprep.subr.bf16.mxu1 %v999_v43  ;;  %478 = vmatmul.mubr.bf16.vlgmr.msra.gmra.mrb[0].mxu0 %v35_v37 }
  0x23   :  { %874 = vmatpush3.bf16.msra.mxu0 %v967_v42  ;;  %559 = vmatprep.mubr.bf16.mxu0 %v40_v60 }
  0x24   :  { %519 = vmatmul.mubr.bf16.vlgmr.msra.gmra.mrb[0].mxu1 %v37_v46  ;;  %875 = vmatprep.subr.bf16.mxu0 %v968_v47 }
  0x25   :  { %908 = vmatprep.mubr.msk.bf16.mxu1 %vm1000_vm0, %v999_v43  ;;  %907 = vmatpush3.bf16.msra.mxu1 %v982_v56 }
  0x26   :  { %912 = vmatprep.subr.bf16.mxu1 %v999_v43 }
  0x27   :  { %876 = vmatpush3.bf16.msra.mxu0 %v969_v48 }
  0x28   :  { %877 = vmatprep.subr.bf16.mxu0 %v970_v49  ;;  %v811_v49 = vld [vmem:[%s1270_s4] ss:$0 sm:$0xff] }
  0x2b   :  { %878 = vmatpush3.bf16.msra.mxu0 %v971_v50 }
  0x2c   :  { %879 = vmatprep.subr.bf16.mxu0 %v972_v51  ;;  %909 = vmatmul.mubr.msk.bf16.vlgmr.msra.gmra.mrb[4].mxu1 %vm441_vm1, %v41_v0 }
  0x2d   :  { %928 = vmatprep.mubr.msk.bf16.mxu1 %vm1000_vm0, %v999_v43  ;;  %913 = vmatpush3.bf16.msra.mxu1 %v983_v7 }
  0x2e   :  { %914 = vmatprep.subr.bf16.mxu1 %v999_v43 }
  0x2f   :  { %880 = vmatpush3.bf16.msra.mxu0 %v973_v52 }
  0x30   :  { %881 = vmatprep.subr.bf16.mxu0 %v974_v53 }
  0x31   :  { %915 = vmatpush3.bf16.msra.mxu1 %v984_v8 }
  0x32   :  { %916 = vmatprep.subr.bf16.mxu1 %v999_v43 }
  0x33   :  { %882 = vmatpush3.bf16.msra.mxu0 %v975_v54 }
  0x34   :  { %883 = vmatprep.subr.bf16.mxu0 %v976_v55 }
  0x35   :  { %917 = vmatpush3.bf16.msra.mxu1 %v985_v9 }
  0x36   :  { %918 = vmatprep.subr.bf16.mxu1 %v999_v43 }
  0x37   :  { %884 = vmatpush3.bf16.msra.mxu0 %v977_v59 }
  0x38   :  { %885 = vmatprep.subr.bf16.mxu0 %v978_v63 }
  0x39   :  { %919 = vmatpush3.bf16.msra.mxu1 %v986_v10 }
  0x3a   :  { %920 = vmatprep.subr.bf16.mxu1 %v999_v43 }
  0x3b   :  { %886 = vmatpush3.bf16.msra.mxu0 %v979_v1 }
  0x3c   :  { %887 = vmatprep.subr.bf16.mxu0 %v980_v2 }
  0x3d   :  { %921 = vmatpush3.bf16.msra.mxu1 %v987_v11 }
  0x3e   :  { %922 = vmatprep.subr.bf16.mxu1 %v999_v43 }
  0x3f   :  { %888 = vmatpush3.bf16.msra.mxu0 %v981_v3 }
  0x41   :  { %923 = vmatpush3.bf16.msra.mxu1 %v988_v12 }
  0x42   :  { %560 = vmatmul.mubr.bf16.vlgmr.msra.gmra.mrb[4].mxu0 %v39_v6  ;;  %924 = vmatprep.subr.bf16.mxu1 %v999_v43 }
  0x45   :  { %925 = vmatpush3.bf16.msra.mxu1 %v989_v13 }
  0x46   :  { %926 = vmatprep.subr.bf16.mxu1 %v999_v43 }
  0x49   :  { %927 = vmatpush3.bf16.msra.mxu1 %v990_v14 }
  0xf5   :  { %v845_v15 = vpop.f32.mrb[0].mxu0 }
  0xf6   :  { %v846_v17 = vpop.f32.mrb[1].mxu0 }
  0xf7   :  { %v847_v18 = vadd.f32 %v846_v17, %v845_v15  ;;  %v848_v19 = vpop.f32.mrb[2].mxu0  ;;  %v867_v20 = vpop.f32.mrb[0].mxu1 }
  0xf8   :  { %v849_v21 = vpop.f32.mrb[3].mxu0  ;;  %v868_v24 = vpop.f32.mrb[1].mxu1 }
  0xf9   :  { %v480_v22 = vadd.f32 %v847_v18, %v760_v16  ;;  %v850_v23 = vadd.f32 %v849_v21, %v848_v19  ;;  %v869_v25 = vadd.f32 %v868_v24, %v867_v20  ;;  %v870_v26 = vpop.f32.mrb[2].mxu1 }
  0xfa   :  { %v871_v28 = vpop.f32.mrb[3].mxu1 }
  0xfb   :  { %v483_v27 = vadd.f32 %v850_v23, %v760_v16  ;;  %v521_v29 = vadd.f32 %v869_v25, %v480_v22  ;;  %v872_v30 = vadd.f32 %v871_v28, %v870_v26 }
  0xfd   :  { %v524_v31 = vadd.f32 %v872_v30, %v483_v27 }
  0xff   :  { %v602_v32 = vpop.f32.mrb[4].mxu1 }
 0x100   :  { %v910_v33 = vpop.f32.mrb[5].mxu1 }
 0x101   :  { %v605_v34 = vpop.f32.mrb[6].mxu1 }
 0x102   :  { %v911_v35 = vpop.f32.mrb[7].mxu1 }
 0x115   :  { %v889_v36 = vpop.f32.mrb[4].mxu0 }
 0x116   :  { %v890_v37 = vpop.f32.mrb[5].mxu0 }
 0x117   :  { %v891_v38 = vadd.f32 %v890_v37, %v889_v36  ;;  %v892_v39 = vpop.f32.mrb[6].mxu0 }
 0x118   :  { %v893_v40 = vpop.f32.mrb[7].mxu0 }
 0x119   :  { %v562_v41 = vadd.f32 %v891_v38, %v521_v29  ;;  %v894_v42 = vadd.f32 %v893_v40, %v892_v39 }
 0x11b   :  { %v603_v43 = vadd.f32 %v602_v32, %v562_v41  ;;  %v565_v44 = vadd.f32 %v894_v42, %v524_v31 }
 0x11d   :  { %v606_v45 = vadd.f32 %v605_v34, %v565_v44  ;;  %v609_v46 = vmax.f32 %v603_v43, 0.0 }
 0x11f   :  { %v610_v47 = vmax.f32 %v606_v45, 0.0 }
 0x121   :  { %v611_v48 = vpack.c.bf16 %v610_v47, %v609_v46 }
 0x123   :  { %929 = vmatmul.mubr.bf16.vlgmr.msra.gmra.mrb[8].mxu1 %v611_v48 }
 0x1f6   :  { %v717_v50 = vpop.f32.mrb[8].mxu1 }
 0x1f7   :  { %v718_v51 = vadd.f32 %v811_v49, %v717_v50  ;;  %v930_v52 = vpop.f32.mrb[9].mxu1 }
 0x1f8   :  { %v720_v53 = vpop.f32.mrb[10].mxu1 }
 0x1f9   :  { %724 = vmax.xlane.f32.xlu0 %v718_v51  ;;  %v931_v54 = vpop.f32.mrb[11].mxu1  ;;  %v721_v55 = vadd.f32 %v811_v49, %v720_v53 }
 0x1fd   :  { %726 = vmax.xlane.f32.xlu0 %v721_v55 }
 0x286   :  { %v725_v56 = vpop.xlane.xlu0 %724 }
 0x287   :  { %v728_v57 = vsub.f32 %v718_v51, %v725_v56 }
 0x289   :  { %v730_v58 = vmul.f32 1.442695, %v728_v57 }
 0x28a   :  { %v727_v59 = vpop.xlane.xlu0 %726 }
 0x28b   :  { %v729_v60 = vsub.f32 %v721_v55, %v727_v59  ;;  %991 = vpow2.f32 %v730_v58 }
 0x28d   :  { %v732_v61 = vmul.f32 1.442695, %v729_v60 }
 0x28f   :  { %993 = vpow2.f32 %v732_v61 }
 0x295   :  { %v992_v62 = vpop.eup %991 }
 0x296   :  { %734 = vadd.xlane.f32.xlu1 %v992_v62 }
 0x299   :  { %v994_v63 = vpop.eup %993 }
 0x29a   :  { %736 = vadd.xlane.f32.xlu1 %v994_v63 }
 0x323   :  { %v735_v0 = vpop.xlane.xlu1 %734 }
 0x324   :  { %995 = vlog2.f32 %v735_v0 }
 0x327   :  { %v737_v1 = vpop.xlane.xlu1 %736 }
 0x328   :  { %997 = vlog2.f32 %v737_v1 }
 0x32e   :  { %v996_v2 = vpop.eup %995 }
 0x32f   :  { %v739_v3 = vmul.f32 0.6931472, %v996_v2 }
 0x331   :  { %v742_v5 = vadd.f32 %v739_v3, %v725_v56 }
 0x332   :  { %v998_v4 = vpop.eup %997 }
 0x333   :  { %v741_v6 = vmul.f32 0.6931472, %v998_v4  ;;  %v744_v8 = vsub.f32 %v718_v51, %v742_v5 }
 0x335   :  { %v743_v7 = vadd.f32 %v741_v6, %v727_v59 }
 0x337   :  { %v745_v9 = vsub.f32 %v721_v55, %v743_v7 }
 0x339   :  { %v827_v10 = vpack.c.bf16 %v745_v9, %v744_v8 }
 0x33b   :  { %828 = vst [vmem:[%s1271_s5] sm:$0xff] %v827_v10  }

</bundles_post_ra>
